<compile_context>
chip_gen: v5e
topology: v5e:2x2
jax: 0.10.0
libtpu: 0.0.40
codegen_flags: <defaults>
</compile_context>

<pallas_src>
import functools

import jax
import jax.numpy as jnp
from jax.experimental import pallas as pl
from jax.experimental.pallas import tpu as pltpu


class GemmaConfig:
    def __init__(self, vocab_size, hidden_size, intermediate_size,
                 num_hidden_layers, num_attention_heads, num_key_value_heads,
                 head_dim=256, max_position_embeddings=8192, rms_norm_eps=1e-06,
                 rope_theta=10000.0, attention_bias=False, attention_dropout=0.0,
                 pad_token_id=None, **kwargs):
        self.vocab_size = vocab_size
        self.max_position_embeddings = max_position_embeddings
        self.hidden_size = hidden_size
        self.intermediate_size = intermediate_size
        self.num_hidden_layers = num_hidden_layers
        self.num_attention_heads = num_attention_heads
        self.head_dim = head_dim
        self.num_key_value_heads = num_key_value_heads
        self.rms_norm_eps = rms_norm_eps
        self.rope_theta = rope_theta
        self.attention_bias = attention_bias
        self.attention_dropout = attention_dropout
        self.pad_token_id = pad_token_id


def _round_up(x, m):
    return (x + m - 1) // m * m


def _vmem_cap_bytes():
    """Generation-aware scoped-VMEM budget.

    ~48 MiB on v7x (64 MiB physical per TC), ~96 MiB on v5e/v6e (128 MiB),
    always leaving headroom for compiler/internal scratch.
    """
    phys = 64 * 2**20  # conservative default (v7x per-TC VMEM)
    try:
        phys = int(getattr(pltpu.get_tpu_info(), "vmem_capacity_bytes", phys))
    except Exception:
        pass
    return int(min(phys * 3 // 4, 100 * 2**20))


# ---------------------------------------------------------------------------
# Pallas kernel: lm_head projection  logits = hidden @ W^T
#   weight pre-transposed to [H, V] so the kernel is a plain (M,K)x(K,N)
#   contraction -> native MXU path, no in-kernel transpose, f32 accumulation.
# ---------------------------------------------------------------------------
def lm_head_kernel(x_ref, w_ref, o_ref):
    # x_ref: (tm, H)  bf16 token tile (resident across the vocab sweep)
    # w_ref: (H, tn)  bf16 pre-transposed weight tile (streamed along vocab)
    # o_ref: (tm, tn) f32 logits tile
    o_ref[...] = jnp.dot(x_ref[...], w_ref[...],
                         preferred_element_type=jnp.float32)


@functools.partial(jax.jit, static_argnames=("vocab_size", "tm", "tn"))
def gemma_lm_head(hidden_states, w_t, *, vocab_size, tm=1024, tn=512):
    """hidden_states: [B, S, H]; w_t: [H, V_pad] bf16 (pre-transposed/padded)
    -> logits [B, S, vocab_size] float32.

    grid = (M/tm, V/tn) with M outer / V inner: the activation tile is
    resident across the vocab sweep; the weight is streamed (M/tm) times.
    tm=1024 keeps each inner step MXU-bound instead of weight-DMA-bound on
    v6e/v7x; decode-sized M uses tm=M and a wide vocab tile instead.
    """
    B, S, H = hidden_states.shape
    H2, V_pad = w_t.shape
    assert H == H2, "hidden size mismatch"
    M = B * S

    # bf16 activations -> fast MXU path; f32 accumulation in-kernel.
    x2d = hidden_states.reshape(M, H).astype(jnp.bfloat16)

    decode = M <= 64
    if decode:
        # Decode lm_head is a pure weight stream (GEMV-like): tiny token tile,
        # wide vocab tile to amortize per-grid-step overhead.
        tm_eff = max(_round_up(M, 16), 16)
        tn_eff = min(2048, V_pad)
    else:
        tm_eff = min(tm, _round_up(M, 16))
        tn_eff = min(tn, V_pad)
    assert V_pad % tn_eff == 0, "weight must be pre-padded to the vocab tile multiple"

    vmem_limit = _vmem_cap_bytes()

    # Conservative working-set estimate (double-buffered everything); shrink
    # tiles if it would not fit the scoped-VMEM budget of this generation.
    # TODO(synk): tile the H (contraction) axis too for very large hidden sizes.
    def _need(tm_, tn_):
        return 2 * (tm_ * H * 2 + H * tn_ * 2 + tm_ * tn_ * 4)

    while _need(tm_eff, tn_eff) > vmem_limit and tm_eff > 256:
        tm_eff //= 2
    while _need(tm_eff, tn_eff) > vmem_limit and tn_eff > 256:
        tn_eff //= 2

    # Pad tokens to the tile multiple (activation only; cheap, zero rows give
    # zero logits and are sliced off before returning).
    M_pad = _round_up(M, tm_eff)
    if M_pad != M:
        x2d = jnp.pad(x2d, ((0, M_pad - M), (0, 0)))

    grid = (M_pad // tm_eff, V_pad // tn_eff)
    n_vocab_steps = grid[1]

    # The activation block index (i, 0) never changes along the inner vocab
    # axis -> a second buffer is wasted VMEM; single-buffer it when there is a
    # sweep.  Decode GEMV: deeper weight buffering to keep HBM saturated.
    x_kwargs = dict(pipeline_mode=pl.Buffered(1)) if n_vocab_steps > 1 else {}
    w_kwargs = (dict(pipeline_mode=pl.Buffered(3))
                if (decode and n_vocab_steps >= 3) else {})

    cost = pl.CostEstimate(
        flops=2 * M_pad * V_pad * H,
        transcendentals=0,
        bytes_accessed=(grid[0] * V_pad * H * 2   # weight streamed once per M tile
                        + M_pad * H * 2           # activation read
                        + M_pad * V_pad * 4),     # f32 logits write
    )

    out = pl.pallas_call(
        lm_head_kernel,
        out_shape=jax.ShapeDtypeStruct((M_pad, V_pad), jnp.float32),
        grid_spec=pltpu.PrefetchScalarGridSpec(
            num_scalar_prefetch=0,
            grid=grid,
            in_specs=[
                # token tile: same block for every inner (vocab) step -> resident
                pl.BlockSpec((tm_eff, H), lambda i, j: (i, 0), **x_kwargs),
                # pre-transposed weight vocab tile streamed along the inner axis
                pl.BlockSpec((H, tn_eff), lambda i, j: (0, j), **w_kwargs),
            ],
            out_specs=pl.BlockSpec((tm_eff, tn_eff), lambda i, j: (i, j)),
        ),
        compiler_params=pltpu.CompilerParams(
            dimension_semantics=("parallel", "parallel"),
            vmem_limit_bytes=vmem_limit,
        ),
        cost_estimate=cost,
    )(x2d, w_t)

    out = out[:M, :vocab_size]
    return out.reshape(B, S, vocab_size)


# ---------------------------------------------------------------------------
# Module wrapper mirroring GemmaForCasualLM.forward
# ---------------------------------------------------------------------------
class GemmaForCausalLMPallas:
    # Pad vocab once to a multiple of the largest vocab tile we ever use so
    # every tn in {128..2048} divides it; done at weight-load time, not per call.
    VOCAB_PAD_MULTIPLE = 2048

    def __init__(self, config: GemmaConfig, key):
        self.config = config
        self.vocab_size = config.vocab_size
        # nn.Linear(hidden_size, vocab_size, bias=False) -> weight [V, H].
        std = 1.0 / (config.hidden_size ** 0.5)
        w = (jax.random.normal(key, (config.vocab_size, config.hidden_size),
                               dtype=jnp.float32) * std)
        # Torch-convention copy kept for reference / weight tying.
        self.lm_head_weight = w.astype(jnp.bfloat16)                     # [V, H]
        # Kernel-ready copy: bf16, transposed to [H, V], vocab padded to the
        # tile multiple — all computed ONCE here, never inside the forward.
        v_pad = _round_up(config.vocab_size, self.VOCAB_PAD_MULTIPLE)
        w_t = jnp.pad(self.lm_head_weight.T,
                      ((0, 0), (0, v_pad - config.vocab_size)))          # [H, V_pad]
        self.lm_head_weight_t = jax.block_until_ready(w_t)
        # TODO(synk): optional fp8 weight quantization with per-tile scales for
        # the v7x MXU fp8 path (halves the weight HBM stream for decode).

    def __call__(self, attention_mask=None, position_ids=None,
                 inputs_embeds=None, kv_cache=None):
        # TODO(synk): reference assigns GemmaConfig as `self.model`, so the inner
        # decoder call is undefined; hidden_states pass through as inputs_embeds.
        hidden_states = inputs_embeds
        logits = gemma_lm_head(hidden_states, self.lm_head_weight_t,
                               vocab_size=self.vocab_size)               # float32
        return_data = {"logits": logits}
        if kv_cache is not None:
            return_data["kv_cache"] = kv_cache
        return return_data


if __name__ == "__main__":
    key = jax.random.PRNGKey(0)
    k_w, k_x = jax.random.split(key)

    # Small Gemma-like config
    config = GemmaConfig(
        vocab_size=256,
        hidden_size=32,
        intermediate_size=64,
        num_hidden_layers=1,
        num_attention_heads=4,
        num_key_value_heads=1,
        head_dim=8,
    )

    B, S, H = 2, 8, config.hidden_size
    inputs_embeds = jax.random.normal(k_x, (B, S, H), dtype=jnp.float32)
    attention_mask = jnp.ones((B, S), dtype=jnp.int32)
    position_ids = jnp.arange(S, dtype=jnp.int32)[None, :].repeat(B, axis=0)

    model = GemmaForCausalLMPallas(config, k_w)
    out = model(attention_mask=attention_mask, position_ids=position_ids,
                inputs_embeds=inputs_embeds, kv_cache=None)
    logits = jax.block_until_ready(out["logits"])

    # Correctness check: reference computed with the same bf16 operands and
    # f32 accumulation as the kernel.
    x_bf16 = inputs_embeds.astype(jnp.bfloat16)
    ref = jnp.einsum("bsh,vh->bsv", x_bf16, model.lm_head_weight,
                     preferred_element_type=jnp.float32)
    assert logits.shape == (B, S, config.vocab_size)
    assert logits.dtype == jnp.float32
    assert jnp.max(jnp.abs(logits - ref)) < 1e-2

    print("KERNEL_OK")
</pallas_src>

<mosaic_0001>
module attributes {stable_mosaic.version = 11 : i64} {
  func.func @lm_head_kernel(%arg0: i32, %arg1: i32, %arg2: memref<16x32xbf16, #tpu.memory_space<vmem>>, %arg3: memref<32x2048xbf16, #tpu.memory_space<vmem>>, %arg4: memref<16x2048xf32, #tpu.memory_space<vmem>>) attributes {dimension_semantics = [#tpu.dimension_semantics<parallel>, #tpu.dimension_semantics<parallel>], iteration_bounds = array<i64: 1, 1>, scalar_prefetch = 0 : i64, scratch_operands = 0 : i64, tpu.core_type = #tpu.core_type<tc>, window_params = [{transform_indices = @transform_0, window_bounds = array<i64: 16, 32>}, {transform_indices = @transform_1, window_bounds = array<i64: 32, 2048>}, {transform_indices = @transform_2, window_bounds = array<i64: 16, 2048>}]} {
    %c0 = arith.constant 0 : index
    %c0_0 = arith.constant 0 : index
    %0 = vector.load %arg2[%c0, %c0_0] : memref<16x32xbf16, #tpu.memory_space<vmem>>, vector<16x32xbf16>
    %c0_1 = arith.constant 0 : index
    %c0_2 = arith.constant 0 : index
    %1 = vector.load %arg3[%c0_1, %c0_2] : memref<32x2048xbf16, #tpu.memory_space<vmem>>, vector<32x2048xbf16>
    %cst = arith.constant dense<0.000000e+00> : vector<16x2048xf32>
    %2 = tpu.matmul %0, %1, %cst {dimension_numbers = #tpu.dot_dimension_numbers<[1], [0], [0], [1], [0, 0, 1, 1], [], []>} : vector<16x32xbf16>, vector<32x2048xbf16>, vector<16x2048xf32> -> vector<16x2048xf32>
    %c0_3 = arith.constant 0 : index
    %c0_4 = arith.constant 0 : index
    %3 = vector.load %arg4[%c0_3, %c0_4] : memref<16x2048xf32, #tpu.memory_space<vmem>>, vector<16x2048xf32>
    tpu.vector_store %arg4[%c0_3, %c0_4], %2 {strides = array<i32>} : memref<16x2048xf32, #tpu.memory_space<vmem>>, vector<16x2048xf32>,
    return
  }
  func.func @transform_0(%arg0: i32, %arg1: i32) -> (i32, i32) {
    %c0_i32 = arith.constant 0 : i32
    %c0_i32_0 = arith.constant 0 : i32
    return %arg0, %c0_i32 : i32, i32
  }
  func.func @transform_1(%arg0: i32, %arg1: i32) -> (i32, i32) {
    %c0_i32 = arith.constant 0 : i32
    %c0_i32_0 = arith.constant 0 : i32
    return %c0_i32, %arg1 : i32, i32
  }
  func.func @transform_2(%arg0: i32, %arg1: i32) -> (i32, i32) {
    %c0_i32 = arith.constant 0 : i32
    return %arg0, %arg1 : i32, i32
  }
}

</mosaic_0001>

<bundles_post_ra>
// kernel: gemma_lm_head.1
= control target key start
LH: loop header
LB: loop body
LE: loop exit
PB: predicated region body
PF: predicated region fallthrough
CT: control target
= control target key end

     0   :  { %7 = vsyncpa [#allocation3], 0  ;;  %s702_s12 = smov [#allocation2]   ;;  %s703_s14 = smov 1024   ;;  %s856_s0 = inlined_call_operand.vmem [shape: bf16[16,32], index: 0, kind: input, shape index: {}]   ;;  %s857_s1 = inlined_call_operand.hbm [shape: bf16[32,2048], index: 1, kind: input, shape index: {}]   ;;  %s858_s2 = inlined_call_operand.vmem [shape: f32[16,2048], index: 2, kind: output, shape index: {}]  }
   0x1   :  { %s14_s11 = sshll.u32 %s857_s1, 4  ;;  %s16_s13 = sshll.u32 %s702_s12, 4  ;;  %s15_s11 = int_to_ptr.hbm [resolvable:$true] %s14_s11  ;;  %s17_s13 = int_to_ptr.vmem [resolvable:$true] %s16_s13 }
   0x2   :  { %s704_s15 = smov 64  }
   0x3   :  { %22 = dma.hbm_to_vmem [thread:$0]  %s15_s11, 4096, %s17_s13, [#allocation3], %s703_s14, %s703_s14, %s704_s15  }
   0x4   :  { %700 = dma.done.wait [#allocation3], 4096  }
   0x5   :  { %701 = vsyncadd [#allocation3], 4294963200  ;;  %v562_v0 = vld [vmem:[#allocation2 + $0x80] sm:$0xf]  ;;  %v657_v2 = vld [vmem:[#allocation2 + $0x84] sm:$0xf] }
   0x6   :  { %v665_v1 = vld [vmem:[#allocation2 + $0xbc] sm:$0xf0]  ;;  %v564_v4 = vld [vmem:[#allocation2 + $0xc0] sm:$0xf0]  ;;  %v570_v5 = vld [vmem:[#allocation2 + $0x88] sm:$0xf] }
   0x7   :  { %v563_v3 = vor.u32 %v665_v1, %v562_v0  ;;  %v666_v6 = vld [vmem:[#allocation2 + $0xc4] sm:$0xf0]  ;;  %v567_v7 = vor.u32 %v657_v2, %v564_v4  ;;  %v658_v9 = vld [vmem:[#allocation2 + $0x8c] sm:$0xf]  ;;  %v498_v11 = vld [vmem:[#allocation2] sm:$0xf] }
   0x8   :  { %v571_v8 = vor.u32 %v666_v6, %v570_v5  ;;  %v572_v10 = vld [vmem:[#allocation2 + $0xc8] sm:$0xf0]  ;;  %v649_v13 = vld [vmem:[#allocation2 + $0x3c] sm:$0xf0]  ;;  %v641_v14 = vld [vmem:[#allocation2 + $0x4] sm:$0xf] }
   0x9   :  { %237 = vmatpush.bf16.msra.mxu0 %v563_v3  ;;  %v575_v12 = vor.u32 %v658_v9, %v572_v10  ;;  %v500_v15 = vld [vmem:[#allocation2 + $0x40] sm:$0xf0]  ;;  %251 = vmatpush.bf16.msra.mxu1 %v567_v7  ;;  %v499_v16 = vor.u32 %v649_v13, %v498_v11  ;;  %v506_v18 = vld [vmem:[#allocation2 + $0x8] sm:$0xf]  ;;  %v642_v20 = vld [vmem:[#allocation2 + $0xc] sm:$0xf] }
   0xa   :  { %265 = vmatpush.bf16.msra.mxu2 %v571_v8  ;;  %v503_v17 = vor.u32 %v641_v14, %v500_v15  ;;  %v650_v19 = vld [vmem:[#allocation2 + $0x44] sm:$0xf0]  ;;  %v508_v22 = vld [vmem:[#allocation2 + $0x48] sm:$0xf0]  ;;  %v726_v23 = vld [vmem:[%s856_s0] sm:$0xff]  ;;  %vm227_vm0 = vcmask 261120  }
   0xb   :  { %279 = vmatpush.bf16.msra.mxu3 %v575_v12  ;;  %v507_v21 = vor.u32 %v650_v19, %v506_v18  ;;  %v586_v24 = vld [vmem:[#allocation2 + $0x98] sm:$0xf]  ;;  %v511_v25 = vor.u32 %v642_v20, %v508_v22  ;;  %v660_v27 = vld [vmem:[#allocation2 + $0x9c] sm:$0xf]  ;;  %v578_v31 = vld [vmem:[#allocation2 + $0x90] sm:$0xf] }
   0xc   :  { %v668_v26 = vld [vmem:[#allocation2 + $0xd4] sm:$0xf0]  ;;  %v588_v28 = vld [vmem:[#allocation2 + $0xd8] sm:$0xf0]  ;;  %v667_v32 = vld [vmem:[#allocation2 + $0xcc] sm:$0xf0] }
   0xd   :  { %238 = vmatpush.bf16.msra.mxu0 %v499_v16  ;;  %v587_v29 = vor.u32 %v668_v26, %v586_v24  ;;  %v591_v30 = vor.u32 %v660_v27, %v588_v28  ;;  %v659_v33 = vld [vmem:[#allocation2 + $0x94] sm:$0xf]  ;;  %252 = vmatpush.bf16.msra.mxu1 %v503_v17  ;;  %v579_v34 = vor.u32 %v667_v32, %v578_v31  ;;  %v522_v36 = vld [vmem:[#allocation2 + $0x18] sm:$0xf]  ;;  %v644_v40 = vld [vmem:[#allocation2 + $0x1c] sm:$0xf] }
   0xe   :  { %266 = vmatpush.bf16.msra.mxu2 %v507_v21  ;;  %v580_v35 = vld [vmem:[#allocation2 + $0xd0] sm:$0xf0]  ;;  %v652_v37 = vld [vmem:[#allocation2 + $0x54] sm:$0xf0]  ;;  %v524_v41 = vld [vmem:[#allocation2 + $0x58] sm:$0xf0] }
   0xf   :  { %280 = vmatpush.bf16.msra.mxu3 %v511_v25  ;;  %v583_v38 = vor.u32 %v659_v33, %v580_v35  ;;  %v523_v39 = vor.u32 %v652_v37, %v522_v36  ;;  %v514_v42 = vld [vmem:[#allocation2 + $0x10] sm:$0xf]  ;;  %v527_v43 = vor.u32 %v644_v40, %v524_v41  ;;  %v643_v45 = vld [vmem:[#allocation2 + $0x14] sm:$0xf]  ;;  %v602_v47 = vld [vmem:[#allocation2 + $0xa8] sm:$0xf] }
  0x10   :  { %624 = vmatmul.msk.bf16.vlgmr.msra.gmra.mxu0 %vm227_vm0, %v726_v23  ;;  %v651_v44 = vld [vmem:[#allocation2 + $0x4c] sm:$0xf0]  ;;  %v516_v46 = vld [vmem:[#allocation2 + $0x50] sm:$0xf0]  ;;  %625 = vmatmul.msk.bf16.vlgmr.msra.gmra.mxu1 %vm227_vm0, %v726_v23  ;;  %v670_v48 = vld [vmem:[#allocation2 + $0xe4] sm:$0xf0] }
  0x11   :  { %626 = vmatmul.msk.bf16.vlgmr.msra.gmra.mxu2 %vm227_vm0, %v726_v23  ;;  %v662_v49 = vld [vmem:[#allocation2 + $0xac] sm:$0xf]  ;;  %293 = vmatpush.bf16.msrb.mxu0 %v579_v34  ;;  %v515_v50 = vor.u32 %v651_v44, %v514_v42  ;;  %v603_v51 = vor.u32 %v670_v48, %v602_v47  ;;  %v594_v53 = vld [vmem:[#allocation2 + $0xa0] sm:$0xf]  ;;  %v519_v55 = vor.u32 %v643_v45, %v516_v46  ;;  %v661_v58 = vld [vmem:[#allocation2 + $0xa4] sm:$0xf] }
  0x12   :  { %321 = vmatpush.bf16.msrb.mxu2 %v587_v29  ;;  %627 = vmatmul.msk.bf16.vlgmr.msra.gmra.mxu3 %vm227_vm0, %v726_v23  ;;  %v604_v52 = vld [vmem:[#allocation2 + $0xe8] sm:$0xf0]  ;;  %v669_v54 = vld [vmem:[#allocation2 + $0xdc] sm:$0xf0]  ;;  %v596_v59 = vld [vmem:[#allocation2 + $0xe0] sm:$0xf0] }
  0x13   :  { %335 = vmatpush.bf16.msrb.mxu3 %v591_v30  ;;  %307 = vmatpush.bf16.msrb.mxu1 %v583_v38  ;;  %v607_v56 = vor.u32 %v662_v49, %v604_v52  ;;  %v595_v57 = vor.u32 %v669_v54, %v594_v53  ;;  %v538_v60 = vld [vmem:[#allocation2 + $0x28] sm:$0xf]  ;;  %v599_v61 = vor.u32 %v661_v58, %v596_v59  ;;  %v646_v63 = vld [vmem:[#allocation2 + $0x2c] sm:$0xf]  ;;  %v530_v3 = vld [vmem:[#allocation2 + $0x20] sm:$0xf] }
  0x14   :  { %v654_v62 = vld [vmem:[#allocation2 + $0x64] sm:$0xf0]  ;;  %v540_v0 = vld [vmem:[#allocation2 + $0x68] sm:$0xf0]  ;;  %v653_v4 = vld [vmem:[#allocation2 + $0x5c] sm:$0xf0] }
  0x15   :  { %v539_v1 = vor.u32 %v654_v62, %v538_v60  ;;  %v543_v2 = vor.u32 %v646_v63, %v540_v0  ;;  %v645_v5 = vld [vmem:[#allocation2 + $0x24] sm:$0xf]  ;;  %294 = vmatpush.bf16.msrb.mxu0 %v515_v50  ;;  %v531_v7 = vor.u32 %v653_v4, %v530_v3  ;;  %v618_v9 = vld [vmem:[#allocation2 + $0xb8] sm:$0xf]  ;;  %v664_v11 = vld [vmem:[#allocation2 + $0xbc] sm:$0xf] }
  0x16   :  { %322 = vmatpush.bf16.msrb.mxu2 %v523_v39  ;;  %v532_v6 = vld [vmem:[#allocation2 + $0x60] sm:$0xf0]  ;;  %v672_v10 = vld [vmem:[#allocation2 + $0xf4] sm:$0xf0]  ;;  %v620_v12 = vld [vmem:[#allocation2 + $0xf8] sm:$0xf0] }
  0x17   :  { %336 = vmatpush.bf16.msrb.mxu3 %v527_v43  ;;  %308 = vmatpush.bf16.msrb.mxu1 %v519_v55  ;;  %v535_v8 = vor.u32 %v645_v5, %v532_v6  ;;  %v610_v13 = vld [vmem:[#allocation2 + $0xb0] sm:$0xf]  ;;  %v663_v15 = vld [vmem:[#allocation2 + $0xb4] sm:$0xf]  ;;  %v619_v17 = vor.u32 %v672_v10, %v618_v9  ;;  %v623_v18 = vor.u32 %v664_v11, %v620_v12  ;;  %v554_v20 = vld [vmem:[#allocation2 + $0x38] sm:$0xf] }
  0x18   :  { %v671_v14 = vld [vmem:[#allocation2 + $0xec] sm:$0xf0]  ;;  %v612_v16 = vld [vmem:[#allocation2 + $0xf0] sm:$0xf0]  ;;  %v656_v21 = vld [vmem:[#allocation2 + $0x74] sm:$0xf0] }
  0x19   :  { %349 = vmatpush.bf16.msra.mxu0 %v595_v57  ;;  %v611_v19 = vor.u32 %v671_v14, %v610_v13  ;;  %v648_v22 = vld [vmem:[#allocation2 + $0x3c] sm:$0xf]  ;;  %v615_v24 = vor.u32 %v663_v15, %v612_v16  ;;  %v546_v26 = vld [vmem:[#allocation2 + $0x30] sm:$0xf]  ;;  %v647_v28 = vld [vmem:[#allocation2 + $0x34] sm:$0xf]  ;;  %v555_v30 = vor.u32 %v656_v21, %v554_v20 }
  0x1a   :  { %377 = vmatpush.bf16.msra.mxu2 %v603_v51  ;;  %v556_v25 = vld [vmem:[#allocation2 + $0x78] sm:$0xf0]  ;;  %v655_v27 = vld [vmem:[#allocation2 + $0x6c] sm:$0xf0]  ;;  %v548_v29 = vld [vmem:[#allocation2 + $0x70] sm:$0xf0] }
  0x1b   :  { %391 = vmatpush.bf16.msra.mxu3 %v607_v56  ;;  %363 = vmatpush.bf16.msra.mxu1 %v599_v61  ;;  %v559_v31 = vor.u32 %v648_v22, %v556_v25  ;;  %v547_v32 = vor.u32 %v655_v27, %v546_v26  ;;  %v551_v33 = vor.u32 %v647_v28, %v548_v29 }
  0x1d   :  { %350 = vmatpush.bf16.msra.mxu0 %v531_v7 }
  0x1e   :  { %378 = vmatpush.bf16.msra.mxu2 %v539_v1 }
  0x1f   :  { %392 = vmatpush.bf16.msra.mxu3 %v543_v2  ;;  %364 = vmatpush.bf16.msra.mxu1 %v535_v8 }
  0x20   :  { %628 = vmatmul.msk.bf16.vlgmr.msrb.gmra.mxu0 %vm227_vm0, %v726_v23  ;;  %629 = vmatmul.msk.bf16.vlgmr.msrb.gmra.mxu1 %vm227_vm0, %v726_v23 }
  0x21   :  { %630 = vmatmul.msk.bf16.vlgmr.msrb.gmra.mxu2 %vm227_vm0, %v726_v23  ;;  %405 = vmatpush.bf16.msrb.mxu0 %v611_v19 }
  0x22   :  { %631 = vmatmul.msk.bf16.vlgmr.msrb.gmra.mxu3 %vm227_vm0, %v726_v23  ;;  %433 = vmatpush.bf16.msrb.mxu2 %v619_v17 }
  0x23   :  { %447 = vmatpush.bf16.msrb.mxu3 %v623_v18  ;;  %419 = vmatpush.bf16.msrb.mxu1 %v615_v24 }
  0x25   :  { %406 = vmatpush.bf16.msrb.mxu0 %v547_v32 }
  0x26   :  { %434 = vmatpush.bf16.msrb.mxu2 %v555_v30 }
  0x27   :  { %448 = vmatpush.bf16.msrb.mxu3 %v559_v31  ;;  %420 = vmatpush.bf16.msrb.mxu1 %v551_v33 }
  0x30   :  { %632 = vmatmul.msk.bf16.vlgmr.msra.gmra.mxu0 %vm227_vm0, %v726_v23  ;;  %633 = vmatmul.msk.bf16.vlgmr.msra.gmra.mxu1 %vm227_vm0, %v726_v23 }
  0x31   :  { %634 = vmatmul.msk.bf16.vlgmr.msra.gmra.mxu2 %vm227_vm0, %v726_v23 }
  0x32   :  { %635 = vmatmul.msk.bf16.vlgmr.msra.gmra.mxu3 %vm227_vm0, %v726_v23 }
  0x40   :  { %636 = vmatmul.msk.bf16.vlgmr.msrb.gmra.mxu0 %vm227_vm0, %v726_v23  ;;  %637 = vmatmul.msk.bf16.vlgmr.msrb.gmra.mxu1 %vm227_vm0, %v726_v23 }
  0x41   :  { %638 = vmatmul.msk.bf16.vlgmr.msrb.gmra.mxu2 %vm227_vm0, %v726_v23 }
  0x42   :  { %639 = vmatmul.msk.bf16.vlgmr.msrb.gmra.mxu3 %vm227_vm0, %v726_v23 }
  0x8d   :  { %v240_v34 = vpop.f32.mrf.mxu0  ;;  %v254_v35 = vpop.f32.mrf.mxu1 }
  0x8e   :  { %455 = vst [vmem:[%s858_s2] sm:$0xff] %v240_v34 }
  0x8f   :  { %456 = vst [vmem:[%s858_s2 + $0x8] sm:$0xff] %v254_v35 }
  0x94   :  { %v268_v36 = vpop.f32.mrf.mxu2 }
  0x95   :  { %457 = vst [vmem:[%s858_s2 + $0x10] sm:$0xff] %v268_v36  ;;  %v282_v37 = vpop.f32.mrf.mxu3  ;;  %v242_v38 = vpop.f32.mrf.mxu0 }
  0x96   :  { %458 = vst [vmem:[%s858_s2 + $0x18] sm:$0xff] %v282_v37  ;;  %v256_v23 = vpop.f32.mrf.mxu1 }
  0x97   :  { %471 = vst [vmem:[%s858_s2 + $0x80] sm:$0xff] %v242_v38 }
  0x98   :  { %472 = vst [vmem:[%s858_s2 + $0x88] sm:$0xff] %v256_v23 }
  0x9c   :  { %v270_v39 = vpop.f32.mrf.mxu2 }
  0x9d   :  { %473 = vst [vmem:[%s858_s2 + $0x90] sm:$0xff] %v270_v39  ;;  %v284_v40 = vpop.f32.mrf.mxu3  ;;  %v296_v41 = vpop.f32.mrf.mxu0 }
  0x9e   :  { %474 = vst [vmem:[%s858_s2 + $0x98] sm:$0xff] %v284_v40  ;;  %v310_v42 = vpop.f32.mrf.mxu1 }
  0x9f   :  { %459 = vst [vmem:[%s858_s2 + $0x20] sm:$0xff] %v296_v41 }
  0xa0   :  { %460 = vst [vmem:[%s858_s2 + $0x28] sm:$0xff] %v310_v42 }
  0xa4   :  { %v324_v43 = vpop.f32.mrf.mxu2 }
  0xa5   :  { %461 = vst [vmem:[%s858_s2 + $0x30] sm:$0xff] %v324_v43  ;;  %v338_v44 = vpop.f32.mrf.mxu3  ;;  %v298_v45 = vpop.f32.mrf.mxu0 }
  0xa6   :  { %462 = vst [vmem:[%s858_s2 + $0x38] sm:$0xff] %v338_v44  ;;  %v312_v46 = vpop.f32.mrf.mxu1 }
  0xa7   :  { %475 = vst [vmem:[%s858_s2 + $0xa0] sm:$0xff] %v298_v45 }
  0xa8   :  { %476 = vst [vmem:[%s858_s2 + $0xa8] sm:$0xff] %v312_v46 }
  0xac   :  { %v326_v47 = vpop.f32.mrf.mxu2 }
  0xad   :  { %477 = vst [vmem:[%s858_s2 + $0xb0] sm:$0xff] %v326_v47  ;;  %v340_v48 = vpop.f32.mrf.mxu3  ;;  %v352_v49 = vpop.f32.mrf.mxu0 }
  0xae   :  { %478 = vst [vmem:[%s858_s2 + $0xb8] sm:$0xff] %v340_v48  ;;  %v366_v50 = vpop.f32.mrf.mxu1 }
  0xaf   :  { %463 = vst [vmem:[%s858_s2 + $0x40] sm:$0xff] %v352_v49 }
  0xb0   :  { %464 = vst [vmem:[%s858_s2 + $0x48] sm:$0xff] %v366_v50 }
  0xb4   :  { %v380_v51 = vpop.f32.mrf.mxu2 }
  0xb5   :  { %465 = vst [vmem:[%s858_s2 + $0x50] sm:$0xff] %v380_v51  ;;  %v394_v52 = vpop.f32.mrf.mxu3  ;;  %v354_v53 = vpop.f32.mrf.mxu0 }
  0xb6   :  { %466 = vst [vmem:[%s858_s2 + $0x58] sm:$0xff] %v394_v52  ;;  %v368_v54 = vpop.f32.mrf.mxu1 }
  0xb7   :  { %479 = vst [vmem:[%s858_s2 + $0xc0] sm:$0xff] %v354_v53 }
  0xb8   :  { %480 = vst [vmem:[%s858_s2 + $0xc8] sm:$0xff] %v368_v54 }
  0xbc   :  { %v382_v55 = vpop.f32.mrf.mxu2 }
  0xbd   :  { %481 = vst [vmem:[%s858_s2 + $0xd0] sm:$0xff] %v382_v55  ;;  %v396_v56 = vpop.f32.mrf.mxu3  ;;  %v408_v57 = vpop.f32.mrf.mxu0 }
  0xbe   :  { %482 = vst [vmem:[%s858_s2 + $0xd8] sm:$0xff] %v396_v56  ;;  %v422_v58 = vpop.f32.mrf.mxu1 }
  0xbf   :  { %467 = vst [vmem:[%s858_s2 + $0x60] sm:$0xff] %v408_v57 }
  0xc0   :  { %468 = vst [vmem:[%s858_s2 + $0x68] sm:$0xff] %v422_v58 }
  0xc4   :  { %v436_v59 = vpop.f32.mrf.mxu2 }
  0xc5   :  { %469 = vst [vmem:[%s858_s2 + $0x70] sm:$0xff] %v436_v59  ;;  %v450_v60 = vpop.f32.mrf.mxu3  ;;  %v410_v61 = vpop.f32.mrf.mxu0 }
  0xc6   :  { %470 = vst [vmem:[%s858_s2 + $0x78] sm:$0xff] %v450_v60  ;;  %v424_v62 = vpop.f32.mrf.mxu1 }
  0xc7   :  { %483 = vst [vmem:[%s858_s2 + $0xe0] sm:$0xff] %v410_v61 }
  0xc8   :  { %484 = vst [vmem:[%s858_s2 + $0xe8] sm:$0xff] %v424_v62 }
  0xcc   :  { %v438_v63 = vpop.f32.mrf.mxu2 }
  0xcd   :  { %485 = vst [vmem:[%s858_s2 + $0xf0] sm:$0xff] %v438_v63  ;;  %v452_v0 = vpop.f32.mrf.mxu3 }
  0xce   :  { %486 = vst [vmem:[%s858_s2 + $0xf8] sm:$0xff] %v452_v0 }
  0xcf   :  { %491 = vsyncpa [#allocation3], 1 }

</bundles_post_ra>
